<compile_context>
chip_gen: v5e
topology: v5e:2x2
jax: 0.10.0
libtpu: 0.0.40
codegen_flags: <defaults>
</compile_context>

<pallas_src>
import math

import jax
import jax.numpy as jnp
from jax.experimental import pallas as pl
from jax.experimental.pallas import tpu as pltpu


def _attention_kernel(x_ref, wqkv_ref, bqkv_ref, out_ref, map_ref):
    bt, n, d_pad = out_ref.shape

    # Fused QKV projection: one (bt*N, F) @ (F, 3*d_pad) MXU push + one bias add.
    qkv = jnp.dot(x_ref[...], wqkv_ref[...], preferred_element_type=jnp.float32)
    qkv = qkv + bqkv_ref[...]                          # (bt*N, 3*d_pad)

    # Split batch back out (n is a sublane multiple at these shapes, so this is
    # a tile-boundary-preserving reshape) and take vreg-aligned 128-lane slices.
    qkv3 = qkv.reshape(bt, n, 3 * d_pad)
    q = qkv3[:, :, 0 * d_pad:1 * d_pad]                # already scaled by 1/sqrt(D)
    k = qkv3[:, :, 1 * d_pad:2 * d_pad]
    v = qkv3[:, :, 2 * d_pad:3 * d_pad]

    # Scores: contract the shared last dim directly (no K^T materialization).
    scores = jnp.einsum("bqd,bkd->bqk", q, k,
                        preferred_element_type=jnp.float32)   # (bt, N, N)

    # Numerically stable softmax along the last axis (exact reciprocal: the
    # attention map is a returned output with a 1e-4 tolerance).
    m = jnp.max(scores, axis=-1, keepdims=True)
    e = jnp.exp(scores - m)
    denom = jnp.sum(e, axis=-1, keepdims=True)
    attn = e * pl.reciprocal(denom, approx=False)             # (bt, N, N)

    # Attention output (lane-padded to d_pad; padded columns are exactly zero).
    out = jnp.einsum("bqk,bkd->bqd", attn, v,
                     preferred_element_type=jnp.float32)      # (bt, N, d_pad)

    out_ref[...] = out.astype(out_ref.dtype)
    map_ref[...] = attn.astype(map_ref.dtype)


def _round_up(x, m):
    return ((x + m - 1) // m) * m


def _vmem_bytes_per_step(bt, n, f, d_pad):
    """Rough per-grid-step VMEM footprint (f32): double-buffered I/O blocks plus
    live intermediates (qkv, q/k/v, scores/exp/attn, out)."""
    f32 = 4
    rows = bt * n
    io_blocks = 2 * (rows * f                 # x tile
                     + f * 3 * d_pad          # fused weights (resident)
                     + 3 * d_pad              # fused bias (resident)
                     + rows * d_pad           # padded output block
                     + rows * n) * f32        # attention-map block
    intermediates = (rows * 3 * d_pad         # qkv
                     + 3 * rows * d_pad       # q, k, v
                     + 3 * rows * n           # scores, exp, attn
                     + rows * d_pad) * f32    # out
    return io_blocks + intermediates


def _pick_batch_tile(B, n, f, d_pad, vmem_budget):
    """Largest bt that divides B and fits the VMEM budget.  Split into multiple
    grid steps only when each step still has >= 1024 matmul rows (amortizes the
    ~600-cycle per-step cost; lets both v7x TensorCores work, negligible loss on
    single-TC v5e/v6e)."""
    bt = 1
    for cand in range(1, B + 1):
        if B % cand == 0 and _vmem_bytes_per_step(cand, n, f, d_pad) <= vmem_budget:
            bt = cand
    min_rows_for_split = 1024
    if bt == B and B % 2 == 0 and (B // 2) * n >= min_rows_for_split:
        bt = B // 2
    return bt


def attention_layer(x, wq, bq, wk, bk, wv, bv, attention_head_dim):
    """x: (B, N, F) float32. Weights in PyTorch Linear layout: W (D, F), b (D,)."""
    B, N, F = x.shape
    D = attention_head_dim
    d_pad = _round_up(D, 128)          # lane-align each Q/K/V section
    inv_scale = 1.0 / math.sqrt(float(D))

    # Fused, lane-padded weights/bias: (F, 3*d_pad) / (1, 3*d_pad).
    # The 1/sqrt(D) softmax scale is folded into the Q section (zero kernel cost).
    def pad_w(w):                       # (D, F) -> (F, d_pad)
        return jnp.pad(w.T, ((0, 0), (0, d_pad - D)))

    def pad_b(b):                       # (D,) -> (d_pad,)
        return jnp.pad(b, (0, d_pad - D))

    w_qkv = jnp.concatenate([pad_w(wq) * inv_scale, pad_w(wk), pad_w(wv)], axis=1)
    b_qkv = jnp.concatenate([pad_b(bq) * inv_scale, pad_b(bk), pad_b(bv)])
    b_qkv = b_qkv.reshape(1, 3 * d_pad)

    # Chip-aware VMEM budget (v7x has 64 MiB physical vs 128 MiB on v5e/v6e).
    try:
        vmem_cap = int(pltpu.get_tpu_info().vmem_capacity_bytes)
    except Exception:
        vmem_cap = 64 << 20             # conservative fallback (v7x per-TC)
    vmem_budget = int(0.6 * vmem_cap)

    bt = _pick_batch_tile(B, N, F, d_pad, vmem_budget)
    est = _vmem_bytes_per_step(bt, N, F, d_pad)
    # >= 32 MiB (covers v5e's 16 MiB default scoped limit), raised with the tile,
    # capped below physical VMEM.
    vmem_limit = int(min(int(0.8 * vmem_cap), max(32 << 20, 2 * est)))

    # Fold batch into matmul rows in the wrapper (free row-major reshape); the
    # BlockSpec then delivers exactly the 2-D operand the MXU wants.
    x2 = x.reshape(B * N, F)
    grid = (B // bt,)

    out_pad, attn_map = pl.pallas_call(
        _attention_kernel,
        out_shape=(
            jax.ShapeDtypeStruct((B, N, d_pad), jnp.float32),
            jax.ShapeDtypeStruct((B, N, N), jnp.float32),
        ),
        grid_spec=pltpu.PrefetchScalarGridSpec(
            num_scalar_prefetch=0,
            grid=grid,
            in_specs=[
                pl.BlockSpec((bt * N, F), lambda i: (i, 0)),
                pl.BlockSpec((F, 3 * d_pad), lambda i: (0, 0)),
                pl.BlockSpec((1, 3 * d_pad), lambda i: (0, 0)),
            ],
            out_specs=[
                pl.BlockSpec((bt, N, d_pad), lambda i: (i, 0, 0)),
                pl.BlockSpec((bt, N, N), lambda i: (i, 0, 0)),
            ],
        ),
        compiler_params=pltpu.CompilerParams(
            dimension_semantics=("parallel",),
            vmem_limit_bytes=vmem_limit,
        ),
    )(x2, w_qkv, b_qkv)

    # Drop the zero-padded lanes (cheap XLA slice outside the kernel).
    return out_pad[:, :, :D], attn_map


def _reference(x, wq, bq, wk, bk, wv, bv, D):
    q = x @ wq.T + bq
    k = x @ wk.T + bk
    v = x @ wv.T + bv
    scores = jnp.einsum("bnd,bmd->bnm", q, k) / jnp.sqrt(jnp.float32(D))
    attn = jax.nn.softmax(scores, axis=-1)
    return jnp.einsum("bnm,bmd->bnd", attn, v), attn


if __name__ == "__main__":
    feature_dim = 32
    attention_head_dim = 16
    B, N = 2, 8

    key = jax.random.PRNGKey(0)
    kx, k1, k2, k3, k4, k5, k6 = jax.random.split(key, 7)

    x = jax.random.normal(kx, (B, N, feature_dim), dtype=jnp.float32)

    # Deterministic parameter init (PyTorch Linear layout: weight (D, F), bias (D,)).
    bound = 1.0 / math.sqrt(feature_dim)
    wq = jax.random.uniform(k1, (attention_head_dim, feature_dim), jnp.float32, -bound, bound)
    wk = jax.random.uniform(k2, (attention_head_dim, feature_dim), jnp.float32, -bound, bound)
    wv = jax.random.uniform(k3, (attention_head_dim, feature_dim), jnp.float32, -bound, bound)
    bq = jax.random.uniform(k4, (attention_head_dim,), jnp.float32, -bound, bound)
    bk = jax.random.uniform(k5, (attention_head_dim,), jnp.float32, -bound, bound)
    bv = jax.random.uniform(k6, (attention_head_dim,), jnp.float32, -bound, bound)

    out, attn_map = attention_layer(x, wq, bq, wk, bk, wv, bv, attention_head_dim)
    out = jax.block_until_ready(out)
    attn_map = jax.block_until_ready(attn_map)

    ref_out, ref_map = _reference(x, wq, bq, wk, bk, wv, bv, attention_head_dim)
    assert jnp.allclose(out, ref_out, atol=1e-4, rtol=1e-4)
    assert jnp.allclose(attn_map, ref_map, atol=1e-4, rtol=1e-4)

    print("KERNEL_OK")
</pallas_src>

<mosaic_0001>
module attributes {stable_mosaic.version = 11 : i64} {
  func.func @_attention_kernel(%arg0: i32, %arg1: memref<16x32xf32, #tpu.memory_space<vmem>>, %arg2: memref<32x384xf32, #tpu.memory_space<vmem>>, %arg3: memref<1x384xf32, #tpu.memory_space<vmem>>, %arg4: memref<2x8x128xf32, #tpu.memory_space<vmem>>, %arg5: memref<2x8x8xf32, #tpu.memory_space<vmem>>) attributes {dimension_semantics = [#tpu.dimension_semantics<parallel>], iteration_bounds = array<i64: 1>, scalar_prefetch = 0 : i64, scratch_operands = 0 : i64, tpu.core_type = #tpu.core_type<tc>, window_params = [{transform_indices = @transform_0, window_bounds = array<i64: 16, 32>}, {pipeline_mode = #tpu.pipeline_mode<synchronous>, transform_indices = @transform_1, window_bounds = array<i64: 32, 384>}, {pipeline_mode = #tpu.pipeline_mode<synchronous>, transform_indices = @transform_2, window_bounds = array<i64: 1, 384>}, {transform_indices = @transform_3, window_bounds = array<i64: 2, 8, 128>}, {transform_indices = @transform_4, window_bounds = array<i64: 2, 8, 8>}]} {
    %c0 = arith.constant 0 : index
    %c0_0 = arith.constant 0 : index
    %0 = vector.load %arg1[%c0, %c0_0] : memref<16x32xf32, #tpu.memory_space<vmem>>, vector<16x32xf32>
    %c0_1 = arith.constant 0 : index
    %c0_2 = arith.constant 0 : index
    %1 = vector.load %arg2[%c0_1, %c0_2] : memref<32x384xf32, #tpu.memory_space<vmem>>, vector<32x384xf32>
    %cst = arith.constant dense<0.000000e+00> : vector<16x384xf32>
    %2 = tpu.matmul %0, %1, %cst {dimension_numbers = #tpu.dot_dimension_numbers<[1], [0], [0], [1], [0, 0, 1, 1], [], []>} : vector<16x32xf32>, vector<32x384xf32>, vector<16x384xf32> -> vector<16x384xf32>
    %c0_3 = arith.constant 0 : index
    %c0_4 = arith.constant 0 : index
    %3 = vector.load %arg3[%c0_3, %c0_4] : memref<1x384xf32, #tpu.memory_space<vmem>>, vector<1x384xf32>
    %4 = vector.broadcast %3 : vector<1x384xf32> to vector<16x384xf32>
    %5 = arith.addf %2, %4 : vector<16x384xf32>
    %6 = vector.shape_cast %5 : vector<16x384xf32> to vector<2x8x384xf32>
    %7 = vector.extract_strided_slice %6 {offsets = [0, 0, 0], sizes = [2, 8, 128], strides = [1, 1, 1]} : vector<2x8x384xf32> to vector<2x8x128xf32>
    %8 = vector.extract_strided_slice %6 {offsets = [0, 0, 128], sizes = [2, 8, 128], strides = [1, 1, 1]} : vector<2x8x384xf32> to vector<2x8x128xf32>
    %9 = vector.extract_strided_slice %6 {offsets = [0, 0, 256], sizes = [2, 8, 128], strides = [1, 1, 1]} : vector<2x8x384xf32> to vector<2x8x128xf32>
    "tpu.trace_start"() <{level = 10 : i32, message = "bqd,bkd->bqk"}> : () -> ()
    %cst_5 = arith.constant dense<0.000000e+00> : vector<2x8x8xf32>
    %10 = tpu.matmul %7, %8, %cst_5 {dimension_numbers = #tpu.dot_dimension_numbers<[2], [2], [1], [1], [0, 0, 0, 1, 1, 1], [0], [0]>} : vector<2x8x128xf32>, vector<2x8x128xf32>, vector<2x8x8xf32> -> vector<2x8x8xf32>
    "tpu.trace_stop"() : () -> ()
    %cst_6 = arith.constant dense<0xFF800000> : vector<2x8xf32>
    %11 = vector.multi_reduction <maximumf>, %10, %cst_6 [2] : vector<2x8x8xf32> to vector<2x8xf32>
    %12 = vector.shape_cast %11 : vector<2x8xf32> to vector<2x8x1xf32>
    %13 = vector.broadcast %12 : vector<2x8x1xf32> to vector<2x8x8xf32>
    %14 = arith.subf %10, %13 : vector<2x8x8xf32>
    %15 = math.exp %14 : vector<2x8x8xf32>
    %cst_7 = arith.constant dense<0.000000e+00> : vector<2x8xf32>
    %16 = vector.multi_reduction <add>, %15, %cst_7 [2] : vector<2x8x8xf32> to vector<2x8xf32>
    %17 = vector.shape_cast %16 : vector<2x8xf32> to vector<2x8x1xf32>
    %18 = tpu.reciprocal %17 : vector<2x8x1xf32> -> vector<2x8x1xf32>
    %19 = vector.broadcast %18 : vector<2x8x1xf32> to vector<2x8x8xf32>
    %20 = arith.mulf %15, %19 : vector<2x8x8xf32>
    "tpu.trace_start"() <{level = 10 : i32, message = "bqk,bkd->bqd"}> : () -> ()
    %cst_8 = arith.constant dense<0.000000e+00> : vector<2x8x128xf32>
    %21 = tpu.matmul %20, %9, %cst_8 {dimension_numbers = #tpu.dot_dimension_numbers<[2], [1], [1], [2], [0, 0, 0, 1, 1, 2], [0], [0]>} : vector<2x8x8xf32>, vector<2x8x128xf32>, vector<2x8x128xf32> -> vector<2x8x128xf32>
    "tpu.trace_stop"() : () -> ()
    %c0_9 = arith.constant 0 : index
    %c0_10 = arith.constant 0 : index
    %c0_11 = arith.constant 0 : index
    %22 = vector.load %arg4[%c0_9, %c0_10, %c0_11] : memref<2x8x128xf32, #tpu.memory_space<vmem>>, vector<2x8x128xf32>
    tpu.vector_store %arg4[%c0_9, %c0_10, %c0_11], %21 {strides = array<i32>} : memref<2x8x128xf32, #tpu.memory_space<vmem>>, vector<2x8x128xf32>,
    %c0_12 = arith.constant 0 : index
    %c0_13 = arith.constant 0 : index
    %c0_14 = arith.constant 0 : index
    %23 = vector.load %arg5[%c0_12, %c0_13, %c0_14] : memref<2x8x8xf32, #tpu.memory_space<vmem>>, vector<2x8x8xf32>
    tpu.vector_store %arg5[%c0_12, %c0_13, %c0_14], %20 {strides = array<i32>} : memref<2x8x8xf32, #tpu.memory_space<vmem>>, vector<2x8x8xf32>,
    return
  }
  func.func @transform_0(%arg0: i32) -> (i32, i32) {
    %c0_i32 = arith.constant 0 : i32
    %c0_i32_0 = arith.constant 0 : i32
    return %arg0, %c0_i32 : i32, i32
  }
  func.func @transform_1(%arg0: i32) -> (i32, i32) {
    %c0_i32 = arith.constant 0 : i32
    %c0_i32_0 = arith.constant 0 : i32
    %c0_i32_1 = arith.constant 0 : i32
    return %c0_i32, %c0_i32_0 : i32, i32
  }
  func.func @transform_2(%arg0: i32) -> (i32, i32) {
    %c0_i32 = arith.constant 0 : i32
    %c0_i32_0 = arith.constant 0 : i32
    %c0_i32_1 = arith.constant 0 : i32
    return %c0_i32, %c0_i32_0 : i32, i32
  }
  func.func @transform_3(%arg0: i32) -> (i32, i32, i32) {
    %c0_i32 = arith.constant 0 : i32
    %c0_i32_0 = arith.constant 0 : i32
    %c0_i32_1 = arith.constant 0 : i32
    return %arg0, %c0_i32, %c0_i32_0 : i32, i32, i32
  }
  func.func @transform_4(%arg0: i32) -> (i32, i32, i32) {
    %c0_i32 = arith.constant 0 : i32
    %c0_i32_0 = arith.constant 0 : i32
    %c0_i32_1 = arith.constant 0 : i32
    return %arg0, %c0_i32, %c0_i32_0 : i32, i32, i32
  }
}

</mosaic_0001>

<bundles_post_ra>
// kernel: tpu_custom_call.1
= control target key start
LH: loop header
LB: loop body
LE: loop exit
PB: predicated region body
PF: predicated region fallthrough
CT: control target
= control target key end

     0   :  { %10 = vsyncpa [#allocation3], 0  ;;  %s563_s0 = inlined_call_operand.hbm [shape: f32[16,32], index: 0, kind: input, shape index: {}]   ;;  %s564_s1 = inlined_call_operand.hbm [shape: f32[32,384], index: 1, kind: input, shape index: {}]   ;;  %s565_s2 = inlined_call_operand.hbm [shape: f32[1,384], index: 2, kind: input, shape index: {}]   ;;  %s566_s3 = inlined_call_operand.hbm [shape: f32[2,8,128], index: 3, kind: output, shape index: {0}]   ;;  %s567_s4 = inlined_call_operand.hbm [shape: f32[2,8,8], index: 4, kind: output, shape index: {1}]  }
   0x1   :  { %11 = vsyncpa [#allocation6], 0 }
   0x2   :  { %12 = vsyncpa [#allocation4], 0  ;;  %s31_s17 = sshll.u32 %s564_s1, 4  ;;  %s32_s17 = int_to_ptr.hbm [resolvable:$true] %s31_s17 }
   0x3   :  { %13 = vsyncpa [#allocation10], 0  ;;  %s491_s18 = smov [#allocation5]   ;;  %s18_s22 = sshll.u32 %s563_s0, 4  ;;  %s19_s22 = int_to_ptr.hbm [resolvable:$true] %s18_s22 }
   0x4   :  { %s33_s19 = sshll.u32 %s491_s18, 4  ;;  %s492_s23 = smov 384   ;;  %s34_s19 = int_to_ptr.vmem [resolvable:$true] %s33_s19 }
   0x5   :  { %s493_s24 = smov 24   ;;  %s494_s25 = smov [#allocation2]  }
   0x6   :  { %39 = dma.hbm_to_vmem [thread:$0]  %s32_s17, 1536, %s34_s19, [#allocation6], %s492_s23, %s492_s23, %s493_s24  }
   0x7   :  { %s20_s26 = sshll.u32 %s494_s25, 4  ;;  %s495_s27 = smov 128   ;;  %s21_s26 = int_to_ptr.vmem [resolvable:$true] %s20_s26 }
   0x8   :  { %s496_s28 = smov 8   ;;  %s45_s30 = sshll.u32 %s565_s2, 4  ;;  %s46_s30 = int_to_ptr.hbm [resolvable:$true] %s45_s30 }
   0x9   :  { %26 = dma.hbm_to_vmem [thread:$0]  %s19_s22, 256, %s21_s26, [#allocation3], %s495_s27, %s495_s27, %s496_s28  }
   0xa   :  { %s497_s5 = smov [#allocation7]  }
   0xb   :  { %s47_s0 = sshll.u32 %s497_s5, 4  ;;  %s48_s0 = int_to_ptr.vmem [resolvable:$true] %s47_s0 }
   0xc   :  { %50 = dma.hbm_to_vmem [thread:$0]  %s46_s30, 48, %s48_s0, [#allocation6]  }
   0xd   :  { %483 = dma.done.wait [#allocation3], 256  }
   0xe   :  { %484 = vsyncadd [#allocation3], 4294967040 }
   0xf   :  { %485 = dma.done.wait [#allocation6], 1584  }
  0x10   :  { %486 = vsyncadd [#allocation6], 4294965712  ;;  %v75_v0 = vld [vmem:[#allocation5 + $0x50] sm:$0xff]  ;;  %v72_v1 = vld [vmem:[#allocation5 + $0x38] sm:$0xff]  ;;  %vm85_vm0 = vcmask 261120   ;;  %vm201_vm1 = vcmask 64512  }
  0x11   :  { %v74_v2 = vld [vmem:[#allocation5 + $0x48] sm:$0xff]  ;;  %127 = vmatpush.msra.mxu1 %v75_v0  ;;  %v71_v3 = vld [vmem:[#allocation5 + $0x30] sm:$0xff]  ;;  %v69_v4 = vld [vmem:[#allocation5 + $0x20] sm:$0xff]  ;;  %s498_s2 = smov [#allocation9]   ;;  %s319_s9 = sshll.u32 %s567_s4, 4  ;;  %s320_s9 = int_to_ptr.hbm [resolvable:$true] %s319_s9 }
  0x12   :  { %104 = vmatpush.msra.mxu0 %v74_v2  ;;  %v68_v5 = vld [vmem:[#allocation5 + $0x18] sm:$0xff]  ;;  %v66_v6 = vld [vmem:[#allocation5 + $0x8] sm:$0xff]  ;;  %v65_v7 = vld [vmem:[#allocation5] sm:$0xff]  ;;  %s317_s6 = sshll.u32 %s498_s2, 4  ;;  %s499_s10 = smov [#allocation8]   ;;  %s318_s6 = int_to_ptr.vmem [resolvable:$true] %s317_s6 }
  0x13   :  { %128 = vmatpush.msra.mxu1 %v72_v1  ;;  %v63_v8 = vld [vmem:[#allocation2] sm:$0xff]  ;;  %v64_v9 = vld [vmem:[#allocation2 + $0x8] sm:$0xff]  ;;  %v77_v10 = vld [vmem:[#allocation7] sm:$0x7]  ;;  %s304_s11 = sshll.u32 %s499_s10, 4  ;;  %s306_s14 = sshll.u32 %s566_s3, 4  ;;  %s305_s11 = int_to_ptr.vmem [resolvable:$true] %s304_s11  ;;  %s307_s14 = int_to_ptr.hbm [resolvable:$true] %s306_s14 }
  0x14   :  { %105 = vmatpush.msra.mxu0 %v71_v3  ;;  %v80_v11 = vperm.slane %v77_v10, 1  ;;  %v79_v12 = vperm.slane %v77_v10, 0  ;;  %v76_v21 = vld [vmem:[#allocation5 + $0x58] sm:$0xff]  ;;  %v73_v22 = vld [vmem:[#allocation5 + $0x40] sm:$0xff]  ;;  %v70_v23 = vld [vmem:[#allocation5 + $0x28] sm:$0xff]  ;;  %v81_v39 = vperm.slane %v77_v10, 2 }
  0x15   :  { %129 = vmatpush.msra.mxu1 %v69_v4  ;;  %150 = vmatpush.msra.mxu2 %v76_v21  ;;  %v67_v28 = vld [vmem:[#allocation5 + $0x10] sm:$0xff] }
  0x16   :  { %106 = vmatpush.msra.mxu0 %v68_v5 }
  0x17   :  { %130 = vmatpush.msra.mxu1 %v66_v6  ;;  %151 = vmatpush.msra.mxu2 %v73_v22 }
  0x18   :  { %107 = vmatpush.msra.mxu0 %v65_v7  ;;  %340 = vmatmul.msk.f32.vlgmr.msra.gmra.mxu1 %vm85_vm0, %v63_v8 }
  0x19   :  { %338 = vmatmul.msk.f32.vlgmr.msra.gmra.mxu0 %vm85_vm0, %v63_v8  ;;  %152 = vmatpush.msra.mxu2 %v70_v23 }
  0x1b   :  { %153 = vmatpush.msra.mxu2 %v67_v28 }
  0x1c   :  { %342 = vmatmul.msk.f32.vlgmr.msra.gmra.mxu2 %vm85_vm0, %v63_v8 }
  0x20   :  { %341 = vmatmul.msk.f32.gmra.mxu1 %vm85_vm0, %v64_v9 }
  0x21   :  { %339 = vmatmul.msk.f32.gmra.mxu0 %vm85_vm0, %v64_v9 }
  0x24   :  { %343 = vmatmul.msk.f32.gmra.mxu2 %vm85_vm0, %v64_v9 }
  0x95   :  { %v132_v13 = vpop.f32.mrf.mxu1 }
  0x96   :  { %v109_v14 = vpop.f32.mrf.mxu0  ;;  %v133_v15 = vadd.f32 %v132_v13, %v80_v11 }
  0x97   :  { %v110_v16 = vadd.f32 %v109_v14, %v79_v12 }
  0x98   :  { %176 = vmatpush.xpose.msra.mxu3 %v133_v15 }
  0x9b   :  { %177 = vmatmul.f32.vlgmr.msra.gmra.mxu3 %v110_v16 }
  0x9d   :  { %v135_v17 = vpop.f32.mrf.mxu1 }
  0x9e   :  { %v112_v18 = vpop.f32.mrf.mxu0  ;;  %v136_v19 = vadd.f32 %v135_v17, %v80_v11 }
  0x9f   :  { %v113_v20 = vadd.f32 %v112_v18, %v79_v12  ;;  %v155_v40 = vpop.f32.mrf.mxu2 }
  0xa0   :  { %196 = vmatpush.xpose.msrb.mxu3 %v136_v19  ;;  %v156_v41 = vadd.f32 %v155_v40, %v81_v39 }
  0xa3   :  { %197 = vmatmul.f32.vlgmr.msrb.gmra.mxu3 %v113_v20 }
  0xa4   :  { %268 = vmatpush.msra.mxu3 %v156_v41 }
  0xa7   :  { %v158_v42 = vpop.f32.mrf.mxu2 }
  0xa8   :  { %v159_v43 = vadd.f32 %v158_v42, %v81_v39 }
  0xaa   :  { %291 = vmatpush.msrb.mxu0 %v159_v43 }
 0x11e   :  { %v178_v24 = vpop.f32.mrf.mxu3 }
 0x11f   :  { %v202_v25 = vsel %vm201_vm1, %v178_v24, -inf }
 0x120   :  { %203 = vmax.xlane.f32.xlu0 %v202_v25 }
 0x126   :  { %v198_v26 = vpop.f32.mrf.mxu3 }
 0x127   :  { %v205_v27 = vsel %vm201_vm1, %v198_v26, -inf }
 0x128   :  { %206 = vmax.xlane.f32.xlu0 %v205_v27 }
 0x193   :  { %v204_v29 = vpop.xlane.xlu0 %203 }
 0x194   :  { %v208_v30 = vsub.f32 %v178_v24, %v204_v29 }
 0x196   :  { %v210_v31 = vmul.f32 1.442695, %v208_v30 }
 0x198   :  { %355 = vpow2.f32 %v210_v31 }
 0x19b   :  { %v207_v32 = vpop.xlane.xlu0 %206 }
 0x19c   :  { %v209_v33 = vsub.f32 %v198_v26, %v207_v32 }
 0x19e   :  { %v356_v34 = vpop.eup %355  ;;  %v212_v35 = vmul.f32 1.442695, %v209_v33 }
 0x19f   :  { %v214_v36 = vsel %vm201_vm1, %v356_v34, 0.0 }
 0x1a0   :  { %357 = vpow2.f32 %v212_v35  ;;  %215 = vadd.xlane.f32.xlu1 %v214_v36 }
 0x1a6   :  { %v358_v37 = vpop.eup %357 }
 0x1a7   :  { %v217_v38 = vsel %vm201_vm1, %v358_v37, 0.0 }
 0x1a8   :  { %218 = vadd.xlane.f32.xlu1 %v217_v38 }
 0x213   :  { %v216_v44 = vpop.xlane.xlu1 %215 }
 0x214   :  { %359 = vrcp.f32 %v216_v44  ;;  %v231_v49 = vand.u32 2147483648, %v216_v44  ;;  %v229_v51 = vand.u32 2147483647, %v216_v44  ;;  %vm225_vm3 = vweird.f32 %v216_v44 }
 0x216   :  { %v232_v54 = vor.u32 1.1754944e-38, %v231_v49  ;;  %vm230_vm5 = vcmp.eq.f32.partialorder %v229_v51, 8.507059e+37 }
 0x21a   :  { %v360_v45 = vpop.eup %359 }
 0x21b   :  { %v221_v46 = vmul.f32 %v360_v45, %v216_v44  ;;  %v219_v47 = vpop.xlane.xlu1 %218  ;;  %vm226_vm2 = vweird.f32 %v360_v45 }
 0x21c   :  { %361 = vrcp.f32 %v219_v47  ;;  %vm227_vm4 = vmor %vm225_vm3, %vm226_vm2  ;;  %v245_v60 = vand.u32 2147483648, %v219_v47  ;;  %v243_v62 = vand.u32 2147483647, %v219_v47  ;;  %vm239_vm7 = vweird.f32 %v219_v47 }
 0x21d   :  { %v222_v48 = vsub.f32 1.0, %v221_v46 }
 0x21e   :  { %v246_v0 = vor.u32 1.1754944e-38, %v245_v60  ;;  %vm244_vm9 = vcmp.eq.f32.partialorder %v243_v62, 8.507059e+37 }
 0x21f   :  { %v223_v50 = vmul.f32 %v360_v45, %v222_v48 }
 0x221   :  { %v224_v52 = vadd.f32 %v360_v45, %v223_v50 }
 0x222   :  { %v362_v53 = vpop.eup %361 }
 0x223   :  { %v228_v55 = vsel %vm227_vm4, %v360_v45, %v224_v52  ;;  %v235_v56 = vmul.f32 %v362_v53, %v219_v47  ;;  %vm240_vm6 = vweird.f32 %v362_v53 }
 0x224   :  { %v233_v57 = vsel %vm230_vm5, %v232_v54, %v228_v55  ;;  %vm241_vm8 = vmor %vm239_vm7, %vm240_vm6 }
 0x225   :  { %v236_v58 = vsub.f32 1.0, %v235_v56  ;;  %v248_v59 = vmul.f32 %v356_v34, %v233_v57 }
 0x227   :  { %v237_v61 = vmul.f32 %v362_v53, %v236_v58  ;;  %344 = vmatmul.msk.f32.vlgmr.msra.gmra.mxu3 %vm201_vm1, %v248_v59  ;;  %298 = vst.msk [vmem:[#allocation9] sm:$0xff] %vm201_vm1, %v248_v59 }
 0x229   :  { %v238_v63 = vadd.f32 %v362_v53, %v237_v61 }
 0x22b   :  { %v242_v1 = vsel %vm241_vm8, %v362_v53, %v238_v63 }
 0x22c   :  { %v247_v2 = vsel %vm244_vm9, %v246_v0, %v242_v1 }
 0x22d   :  { %v249_v3 = vmul.f32 %v358_v37, %v247_v2 }
 0x22f   :  { %345 = vmatmul.msk.f32.vlgmr.msrb.gmra.mxu0 %vm201_vm1, %v249_v3  ;;  %299 = vst.msk [vmem:[#allocation9 + $0x8] sm:$0xff] %vm201_vm1, %v249_v3 }
 0x230   :  { %325 = dma.vmem_to_hbm [thread:$0]  %s318_s6, 256, %s320_s9, [#allocation10], %s495_s27, %s495_s27, %s496_s28  }
 0x2aa   :  { %v270_v4 = vpop.f32.mrf.mxu3 }
 0x2ab   :  { %296 = vst [vmem:[#allocation8] sm:$0xff] %v270_v4 }
 0x2ac   :  { %v293_v5 = vpop.f32.mrf.mxu0 }
 0x2ad   :  { %297 = vst [vmem:[#allocation8 + $0x8] sm:$0xff] %v293_v5 }
 0x2ae   :  { %312 = dma.vmem_to_hbm [thread:$0]  %s305_s11, 256, %s307_s14, [#allocation4], %s495_s27, %s495_s27, %s496_s28  }
 0x2af   :  { %487 = dma.done.wait [#allocation4], 256  }
 0x2b0   :  { %488 = vsyncadd [#allocation4], 4294967040 }
 0x2b1   :  { %489 = dma.done.wait [#allocation10], 256  }
 0x2b2   :  { %490 = vsyncadd [#allocation10], 4294967040 }
 0x2b3   :  { %334 = vsyncpa [#allocation3], 1 }
 0x2b4   :  { %335 = vsyncpa [#allocation6], 1 }
 0x2b5   :  { %336 = vsyncpa [#allocation4], 1 }
 0x2b6   :  { %337 = vsyncpa [#allocation10], 1 }

</bundles_post_ra>
